<compile_context>
chip_gen: v7x
topology: tpu7x:2x2x1
jax: 0.10.0
libtpu: 0.0.40
codegen_flags: <defaults>
</compile_context>

<pallas_src>
import functools

import jax
import jax.numpy as jnp
from jax.experimental import pallas as pl
from jax.experimental.pallas import tpu as pltpu

IN_F, H1, H2, OUT_F = 28 * 28, 128, 64, 10
OUT_PAD = 128                 # lane-dense fc3 output width (sliced back to 10 outside)
MAX_TILE_B = 2048             # max batch rows per grid step (amortizes ~0.35us/step)
MIN_TILE_B = 256              # don't shrink tiles below this when targeting many steps
TARGET_STEPS = 8              # >= 4-8 steps keeps v7x's 2 TensorCores busy + pipelined
VMEM_LIMIT = 48 * 1024 * 1024


def _round_up(n, m):
    return ((n + m - 1) // m) * m


def _pick_tile_b(B):
    """Batch rows per grid step: a multiple of 16 (bf16 sublane packing), large
    enough to amortize per-step pipeline overhead, small enough for VMEM and
    for >= TARGET_STEPS grid steps on large batches."""
    if B <= MIN_TILE_B:
        return min(_round_up(B, 16), MAX_TILE_B)
    steps = max(pl.cdiv(B, MAX_TILE_B), min(TARGET_STEPS, B // MIN_TILE_B))
    return min(_round_up(pl.cdiv(B, steps), 16), MAX_TILE_B)


def mlp_kernel(x_ref, w1_ref, b1_ref, w2_ref, b2_ref, w3_ref, b3_ref, o_ref):
    # x arrives in native f32 (no wrapper cast pass); cast to bf16 on-chip just
    # before the MXU dot.  All matmuls accumulate in f32; bias-add + ReLU
    # epilogues run in f32 (v5e VPU has no bf16 ALU), then cast back to bf16.
    x = x_ref[...].astype(jnp.bfloat16)
    h1 = jnp.dot(x, w1_ref[...], preferred_element_type=jnp.float32)
    h1 = jnp.maximum(h1 + b1_ref[...], 0.0).astype(jnp.bfloat16)
    h2 = jnp.dot(h1, w2_ref[...], preferred_element_type=jnp.float32)
    h2 = jnp.maximum(h2 + b2_ref[...], 0.0).astype(jnp.bfloat16)
    h3 = jnp.dot(h2, w3_ref[...], preferred_element_type=jnp.float32)
    # bf16, 128-lane-dense store: half the HBM write of the previous f32 store.
    o_ref[...] = (h3 + b3_ref[...]).astype(o_ref.dtype)


def prepare_params(params):
    """One-time weight prep (outside the per-call path): bf16 weights, fc3
    weight/bias zero-padded 10 -> 128 output lanes, f32 biases."""
    return {
        "w1": params["w1"].astype(jnp.bfloat16),
        "b1": params["b1"].astype(jnp.float32),
        "w2": params["w2"].astype(jnp.bfloat16),
        "b2": params["b2"].astype(jnp.float32),
        "w3": jnp.pad(params["w3"], ((0, 0), (0, OUT_PAD - OUT_F))).astype(jnp.bfloat16),
        "b3": jnp.pad(params["b3"], ((0, 0), (0, OUT_PAD - OUT_F))).astype(jnp.float32),
    }


@functools.partial(jax.jit, static_argnames=("tile_b",))
def simple_nn_forward(x, prep, *, tile_b=None):
    """x: (B, 784) float32 (streamed as-is).  prep: output of prepare_params."""
    B = x.shape[0]
    if tile_b is None:
        tile_b = _pick_tile_b(B)
    assert tile_b % 8 == 0
    grid = (pl.cdiv(B, tile_b),)   # ragged tail -> partial last block (no pad copy)

    def const(shape):
        # Whole array every grid step -> DMA'd once, stays VMEM-resident.
        return pl.BlockSpec(shape, lambda i: (0,) * len(shape))

    weight_bytes = (IN_F * H1 + H1 * H2 + H2 * OUT_PAD) * 2 + (H1 + H2 + OUT_PAD) * 4
    cost = pl.CostEstimate(
        flops=2 * B * (IN_F * H1 + H1 * H2 + H2 * OUT_PAD),
        transcendentals=0,
        bytes_accessed=B * IN_F * 4 + B * OUT_PAD * 2 + weight_bytes,
    )

    out = pl.pallas_call(
        mlp_kernel,
        out_shape=jax.ShapeDtypeStruct((B, OUT_PAD), jnp.bfloat16),
        grid=grid,
        in_specs=[
            pl.BlockSpec((tile_b, IN_F), lambda i: (i, 0)),   # streamed f32 x tile
            const(prep["w1"].shape), const(prep["b1"].shape),
            const(prep["w2"].shape), const(prep["b2"].shape),
            const(prep["w3"].shape), const(prep["b3"].shape),
        ],
        out_specs=pl.BlockSpec((tile_b, OUT_PAD), lambda i: (i, 0)),
        compiler_params=pltpu.CompilerParams(
            dimension_semantics=("parallel",),
            vmem_limit_bytes=VMEM_LIMIT,
        ),
        cost_estimate=cost,
    )(x, prep["w1"], prep["b1"], prep["w2"], prep["b2"], prep["w3"], prep["b3"])

    # Tiny (B, 10) slice + cast; the padded lanes never leave HBM again otherwise.
    return out[:, :OUT_F].astype(jnp.float32)


def init_params(key):
    """Deterministic init mirroring nn.Linear shapes (weights stored as (in, out))."""
    ks = jax.random.split(key, 6)

    def linear(kw, kb, fan_in, fan_out):
        bound = 1.0 / jnp.sqrt(fan_in)
        # PyTorch stores W as (out, in); we store the transpose (in, out).
        w = jax.random.uniform(kw, (fan_in, fan_out), jnp.float32, -bound, bound)
        b = jax.random.uniform(kb, (1, fan_out), jnp.float32, -bound, bound)
        return w, b

    w1, b1 = linear(ks[0], ks[1], IN_F, H1)
    w2, b2 = linear(ks[2], ks[3], H1, H2)
    w3, b3 = linear(ks[4], ks[5], H2, OUT_F)
    return {"w1": w1, "b1": b1, "w2": w2, "b2": b2, "w3": w3, "b3": b3}


def _reference(x, params):
    """Same-precision (bf16 matmul operands, f32 accum/epilogue) plain-JAX reference."""
    xb = x.astype(jnp.bfloat16)
    w1 = params["w1"].astype(jnp.bfloat16)
    w2 = params["w2"].astype(jnp.bfloat16)
    w3 = params["w3"].astype(jnp.bfloat16)
    h = jnp.maximum(
        jnp.dot(xb, w1, preferred_element_type=jnp.float32) + params["b1"], 0.0)
    h = jnp.maximum(
        jnp.dot(h.astype(jnp.bfloat16), w2, preferred_element_type=jnp.float32)
        + params["b2"], 0.0)
    return (jnp.dot(h.astype(jnp.bfloat16), w3, preferred_element_type=jnp.float32)
            + params["b3"])


if __name__ == "__main__":
    key = jax.random.PRNGKey(0)
    k_x, k_p = jax.random.split(key)
    params = init_params(k_p)
    prep = prepare_params(params)   # one-time weight cast/pad, outside the hot path

    # Batch of MNIST-like images (B, 1, 28, 28), flattened like x.view(-1, 784).
    B = 8
    x_img = jax.random.normal(k_x, (B, 1, 28, 28), jnp.float32)
    x = x_img.reshape(-1, IN_F)

    out = jax.block_until_ready(simple_nn_forward(x, prep))
    ref = _reference(x, params)
    assert out.shape == (B, OUT_F)
    # bf16 output store -> slightly looser tolerance than the f32-epilogue reference.
    assert jnp.allclose(out, ref, atol=2e-2, rtol=2e-2)

    # Multi-step grid + ragged batch (partial last block, no pad/copy of x).
    B2 = 19
    x2 = jax.random.normal(k_x, (B2, IN_F), jnp.float32)
    out2 = jax.block_until_ready(simple_nn_forward(x2, prep, tile_b=16))
    ref2 = _reference(x2, params)
    assert out2.shape == (B2, OUT_F)
    assert jnp.allclose(out2, ref2, atol=2e-2, rtol=2e-2)

    print("KERNEL_OK")
</pallas_src>

<mosaic_0001>
module attributes {stable_mosaic.version = 11 : i64} {
  func.func @mlp_kernel(%arg0: i32, %arg1: memref<16x784xf32, #tpu.memory_space<vmem>>, %arg2: memref<784x128xbf16, #tpu.memory_space<vmem>>, %arg3: memref<1x128xf32, #tpu.memory_space<vmem>>, %arg4: memref<128x64xbf16, #tpu.memory_space<vmem>>, %arg5: memref<1x64xf32, #tpu.memory_space<vmem>>, %arg6: memref<64x128xbf16, #tpu.memory_space<vmem>>, %arg7: memref<1x128xf32, #tpu.memory_space<vmem>>, %arg8: memref<16x128xbf16, #tpu.memory_space<vmem>>) attributes {dimension_semantics = [#tpu.dimension_semantics<parallel>], iteration_bounds = array<i64: 1>, scalar_prefetch = 0 : i64, scratch_operands = 0 : i64, tpu.core_type = #tpu.core_type<tc>, window_params = [{transform_indices = @transform_0, window_bounds = array<i64: 16, 784>}, {pipeline_mode = #tpu.pipeline_mode<synchronous>, transform_indices = @transform_1, window_bounds = array<i64: 784, 128>}, {pipeline_mode = #tpu.pipeline_mode<synchronous>, transform_indices = @transform_2, window_bounds = array<i64: 1, 128>}, {pipeline_mode = #tpu.pipeline_mode<synchronous>, transform_indices = @transform_3, window_bounds = array<i64: 128, 64>}, {pipeline_mode = #tpu.pipeline_mode<synchronous>, transform_indices = @transform_4, window_bounds = array<i64: 1, 64>}, {pipeline_mode = #tpu.pipeline_mode<synchronous>, transform_indices = @transform_5, window_bounds = array<i64: 64, 128>}, {pipeline_mode = #tpu.pipeline_mode<synchronous>, transform_indices = @transform_6, window_bounds = array<i64: 1, 128>}, {transform_indices = @transform_7, window_bounds = array<i64: 16, 128>}]} {
    %c0 = arith.constant 0 : index
    %c0_0 = arith.constant 0 : index
    %0 = vector.load %arg1[%c0, %c0_0] : memref<16x784xf32, #tpu.memory_space<vmem>>, vector<16x784xf32>
    %1 = arith.truncf %0 : vector<16x784xf32> to vector<16x784xbf16>
    %c0_1 = arith.constant 0 : index
    %c0_2 = arith.constant 0 : index
    %2 = vector.load %arg2[%c0_1, %c0_2] : memref<784x128xbf16, #tpu.memory_space<vmem>>, vector<784x128xbf16>
    %cst = arith.constant dense<0.000000e+00> : vector<16x128xf32>
    %3 = tpu.matmul %1, %2, %cst {dimension_numbers = #tpu.dot_dimension_numbers<[1], [0], [0], [1], [0, 0, 1, 1], [], []>} : vector<16x784xbf16>, vector<784x128xbf16>, vector<16x128xf32> -> vector<16x128xf32>
    %c0_3 = arith.constant 0 : index
    %c0_4 = arith.constant 0 : index
    %4 = vector.load %arg3[%c0_3, %c0_4] : memref<1x128xf32, #tpu.memory_space<vmem>>, vector<1x128xf32>
    %5 = vector.broadcast %4 : vector<1x128xf32> to vector<16x128xf32>
    %6 = arith.addf %3, %5 : vector<16x128xf32>
    %cst_5 = arith.constant 0.000000e+00 : f32
    %7 = vector.broadcast %cst_5 : f32 to vector<16x128xf32>
    %8 = arith.maximumf %6, %7 : vector<16x128xf32>
    %9 = arith.truncf %8 : vector<16x128xf32> to vector<16x128xbf16>
    %c0_6 = arith.constant 0 : index
    %c0_7 = arith.constant 0 : index
    %10 = vector.load %arg4[%c0_6, %c0_7] : memref<128x64xbf16, #tpu.memory_space<vmem>>, vector<128x64xbf16>
    %cst_8 = arith.constant dense<0.000000e+00> : vector<16x64xf32>
    %11 = tpu.matmul %9, %10, %cst_8 {dimension_numbers = #tpu.dot_dimension_numbers<[1], [0], [0], [1], [0, 0, 1, 1], [], []>} : vector<16x128xbf16>, vector<128x64xbf16>, vector<16x64xf32> -> vector<16x64xf32>
    %c0_9 = arith.constant 0 : index
    %c0_10 = arith.constant 0 : index
    %12 = vector.load %arg5[%c0_9, %c0_10] : memref<1x64xf32, #tpu.memory_space<vmem>>, vector<1x64xf32>
    %13 = vector.broadcast %12 : vector<1x64xf32> to vector<16x64xf32>
    %14 = arith.addf %11, %13 : vector<16x64xf32>
    %cst_11 = arith.constant 0.000000e+00 : f32
    %15 = vector.broadcast %cst_11 : f32 to vector<16x64xf32>
    %16 = arith.maximumf %14, %15 : vector<16x64xf32>
    %17 = arith.truncf %16 : vector<16x64xf32> to vector<16x64xbf16>
    %c0_12 = arith.constant 0 : index
    %c0_13 = arith.constant 0 : index
    %18 = vector.load %arg6[%c0_12, %c0_13] : memref<64x128xbf16, #tpu.memory_space<vmem>>, vector<64x128xbf16>
    %cst_14 = arith.constant dense<0.000000e+00> : vector<16x128xf32>
    %19 = tpu.matmul %17, %18, %cst_14 {dimension_numbers = #tpu.dot_dimension_numbers<[1], [0], [0], [1], [0, 0, 1, 1], [], []>} : vector<16x64xbf16>, vector<64x128xbf16>, vector<16x128xf32> -> vector<16x128xf32>
    %c0_15 = arith.constant 0 : index
    %c0_16 = arith.constant 0 : index
    %20 = vector.load %arg7[%c0_15, %c0_16] : memref<1x128xf32, #tpu.memory_space<vmem>>, vector<1x128xf32>
    %21 = vector.broadcast %20 : vector<1x128xf32> to vector<16x128xf32>
    %22 = arith.addf %19, %21 : vector<16x128xf32>
    %23 = arith.truncf %22 : vector<16x128xf32> to vector<16x128xbf16>
    %c0_17 = arith.constant 0 : index
    %c0_18 = arith.constant 0 : index
    %24 = vector.load %arg8[%c0_17, %c0_18] : memref<16x128xbf16, #tpu.memory_space<vmem>>, vector<16x128xbf16>
    tpu.vector_store %arg8[%c0_17, %c0_18], %23 {strides = array<i32>} : memref<16x128xbf16, #tpu.memory_space<vmem>>, vector<16x128xbf16>,
    return
  }
  func.func @transform_0(%arg0: i32) -> (i32, i32) {
    %c0_i32 = arith.constant 0 : i32
    %c0_i32_0 = arith.constant 0 : i32
    return %arg0, %c0_i32 : i32, i32
  }
  func.func @transform_1(%arg0: i32) -> (i32, i32) {
    %c0_i32 = arith.constant 0 : i32
    %c0_i32_0 = arith.constant 0 : i32
    %c0_i32_1 = arith.constant 0 : i32
    return %c0_i32, %c0_i32_0 : i32, i32
  }
  func.func @transform_2(%arg0: i32) -> (i32, i32) {
    %c0_i32 = arith.constant 0 : i32
    %c0_i32_0 = arith.constant 0 : i32
    %c0_i32_1 = arith.constant 0 : i32
    return %c0_i32, %c0_i32_0 : i32, i32
  }
  func.func @transform_3(%arg0: i32) -> (i32, i32) {
    %c0_i32 = arith.constant 0 : i32
    %c0_i32_0 = arith.constant 0 : i32
    %c0_i32_1 = arith.constant 0 : i32
    return %c0_i32, %c0_i32_0 : i32, i32
  }
  func.func @transform_4(%arg0: i32) -> (i32, i32) {
    %c0_i32 = arith.constant 0 : i32
    %c0_i32_0 = arith.constant 0 : i32
    %c0_i32_1 = arith.constant 0 : i32
    return %c0_i32, %c0_i32_0 : i32, i32
  }
  func.func @transform_5(%arg0: i32) -> (i32, i32) {
    %c0_i32 = arith.constant 0 : i32
    %c0_i32_0 = arith.constant 0 : i32
    %c0_i32_1 = arith.constant 0 : i32
    return %c0_i32, %c0_i32_0 : i32, i32
  }
  func.func @transform_6(%arg0: i32) -> (i32, i32) {
    %c0_i32 = arith.constant 0 : i32
    %c0_i32_0 = arith.constant 0 : i32
    %c0_i32_1 = arith.constant 0 : i32
    return %c0_i32, %c0_i32_0 : i32, i32
  }
  func.func @transform_7(%arg0: i32) -> (i32, i32) {
    %c0_i32 = arith.constant 0 : i32
    %c0_i32_0 = arith.constant 0 : i32
    return %arg0, %c0_i32 : i32, i32
  }
}

</mosaic_0001>

<bundles_post_ra>
// kernel: simple_nn_forward.1
= control target key start
LH: loop header
LB: loop body
LE: loop exit
PB: predicated region body
PF: predicated region fallthrough
CT: control target
= control target key end

     0   :  { %12 = vsyncpa [#allocation3], 0  ;;  %s1166_s24 = smov [#allocation2]   ;;  %s1332_s0 = inlined_call_operand.vmem [shape: f32[8,784], index: 0, kind: input, shape index: {}]   ;;  %s1333_s1 = inlined_call_operand.hbm [shape: bf16[784,128], index: 1, kind: input, shape index: {}]   ;;  %s1334_s2 = inlined_call_operand.vmem [shape: f32[1,128], index: 2, kind: input, shape index: {}]   ;;  %s1335_s3 = inlined_call_operand.vmem [shape: bf16[128,64], index: 3, kind: input, shape index: {}]   ;;  %s1336_s4 = inlined_call_operand.vmem [shape: f32[1,64], index: 4, kind: input, shape index: {}]   ;;  %s1337_s5 = inlined_call_operand.vmem [shape: bf16[64,128], index: 5, kind: input, shape index: {}]   ;;  %s1338_s6 = inlined_call_operand.vmem [shape: f32[1,128], index: 6, kind: input, shape index: {}]   ;;  %s1339_s7 = inlined_call_operand.vmem [shape: bf16[8,128], index: 7, kind: output, shape index: {}]  }
   0x1   :  { %s20_s25 = sshll.u32 %s1166_s24, 4  ;;  %s1142_s28 = scalar_lea.hbm %s1333_s1, 6272  ;;  %s21_s25 = int_to_ptr.vmem [resolvable:$true] %s20_s25 }
   0x2   :  { %p1143_p0 = scmp.ne.s32.totalorder %s1333_s1, %s1142_s28  ;;  %p1146_p1 = scmp.lt.u32.totalorder %s1142_s28, %s1333_s1 }
   0x4   :  { %p1148_p2 = pnand %p1146_p1, %p1143_p0 }
   0x6   :  { %1151 = shalt.err (!%p1148_p2)
}
   0x7   :  { %s1152_s10 = scalar_lea.vmem %s21_s25, 6272  ;;  %p1157_p4 = scmp.lt.s32.totalorder %s21_s25, %s21_s25 }
   0x8   :  { %p1153_p3 = scmp.ne.s32.totalorder %s21_s25, %s1152_s10  ;;  %p1158_p5 = scmp.lt.s32.totalorder %s1152_s10, %s1152_s10 }
   0xa   :  { %p1159_p6 = por %p1158_p5, %p1157_p4 }
   0xc   :  { %p1160_p7 = pnand %p1159_p6, %p1153_p3 }
   0xe   :  { %1163 = shalt.err (!%p1160_p7)
}
   0xf   :  { %s1167_s11 = smov 64   ;;  %s1168_s12 = smov 4  }
  0x10   :  { %26 = dma.hbm_to_vmem [thread:$0]  %s1333_s1, 6272, %s21_s25, [#allocation3], %s1167_s11, %s1167_s11, %s1168_s12  }
  0x11   :  { %1164 = dma.done.wait [#allocation3], 6272  }
  0x12   :  { %1165 = vsyncadd [#allocation3], 4294961024  ;;  %v1081_v0 = vld [vmem:[#allocation2 + $0x40] sm:$0xff]   ;;  %v1085_v4 = vld [vmem:[#allocation2 + $0x48] sm:$0xff]   ;;  %v1169_v43 = vmov 0.0   ;;  %vm1170_vm0 = vmmov 0  }
  0x13   :  { %v1082_v1 = vld [vmem:[#allocation2] sm:$0xff]   ;;  %956 = vmatprep.subr.bf16.mxu0 %v1081_v0  ;;  %v1086_v5 = vld [vmem:[#allocation2 + $0x8] sm:$0xff]   ;;  %v1089_v8 = vld [vmem:[#allocation2 + $0x50] sm:$0xff]   ;;  %vm461_vm1 = vcmask 130048   ;;  %vm786_vm2 = vcmask 523264  }
  0x14   :  { %v1083_v2 = vld [vmem:[#allocation2 + $0xc0] sm:$0xff]   ;;  %957 = vmatpush3.bf16.msra.mxu0 %v1082_v1  ;;  %v1087_v6 = vld [vmem:[#allocation2 + $0xc8] sm:$0xff]   ;;  %v1090_v9 = vld [vmem:[#allocation2 + $0x10] sm:$0xff]  }
  0x15   :  { %v1084_v3 = vld [vmem:[#allocation2 + $0x80] sm:$0xff]   ;;  %978 = vmatprep.subr.bf16.mxu1 %v1083_v2  ;;  %958 = vmatprep.subr.bf16.mxu0 %v1085_v4  ;;  %v1088_v7 = vld [vmem:[#allocation2 + $0x88] sm:$0xff]   ;;  %v1091_v10 = vld [vmem:[#allocation2 + $0xd0] sm:$0xff]  }
  0x16   :  { %979 = vmatpush3.bf16.msra.mxu1 %v1084_v3  ;;  %v1092_v11 = vld [vmem:[#allocation2 + $0x90] sm:$0xff]   ;;  %v1093_v12 = vld [vmem:[#allocation2 + $0x58] sm:$0xff]   ;;  %v1097_v16 = vld [vmem:[#allocation2 + $0x60] sm:$0xff]  }
  0x17   :  { %980 = vmatprep.subr.bf16.mxu1 %v1087_v6  ;;  %v1094_v13 = vld [vmem:[#allocation2 + $0x18] sm:$0xff]   ;;  %v1098_v17 = vld [vmem:[#allocation2 + $0x20] sm:$0xff]   ;;  %v1101_v20 = vld [vmem:[#allocation2 + $0x68] sm:$0xff]  }
  0x18   :  { %959 = vmatpush3.bf16.msra.mxu0 %v1086_v5  ;;  %v1095_v14 = vld [vmem:[#allocation2 + $0xd8] sm:$0xff]   ;;  %v1099_v18 = vld [vmem:[#allocation2 + $0xe0] sm:$0xff]   ;;  %v1102_v21 = vld [vmem:[#allocation2 + $0x28] sm:$0xff]  }
  0x19   :  { %960 = vmatprep.subr.bf16.mxu0 %v1089_v8  ;;  %v1096_v15 = vld [vmem:[#allocation2 + $0x98] sm:$0xff]   ;;  %v1100_v19 = vld [vmem:[#allocation2 + $0xa0] sm:$0xff]   ;;  %v1103_v22 = vld [vmem:[#allocation2 + $0xe8] sm:$0xff]  }
  0x1a   :  { %981 = vmatpush3.bf16.msra.mxu1 %v1088_v7  ;;  %v1104_v23 = vld [vmem:[#allocation2 + $0xa8] sm:$0xff]   ;;  %v1105_v24 = vld [vmem:[#allocation2 + $0x70] sm:$0xff]   ;;  %v1109_v28 = vld [vmem:[#allocation2 + $0x78] sm:$0xff]  }
  0x1b   :  { %982 = vmatprep.subr.bf16.mxu1 %v1091_v10  ;;  %v1106_v25 = vld [vmem:[#allocation2 + $0x30] sm:$0xff]   ;;  %v1110_v29 = vld [vmem:[#allocation2 + $0x38] sm:$0xff]   ;;  %v42_v31 = vld [vmem:[%s1332_s0 + $0x8] sm:$0xff] }
  0x1c   :  { %961 = vmatpush3.bf16.msra.mxu0 %v1090_v9  ;;  %v1107_v26 = vld [vmem:[#allocation2 + $0xf0] sm:$0xff]   ;;  %v1111_v30 = vld [vmem:[#allocation2 + $0xf8] sm:$0xff]   ;;  %v49_v32 = vld [vmem:[%s1332_s0 + $0x40] sm:$0xff] }
  0x1d   :  { %962 = vmatprep.subr.bf16.mxu0 %v1093_v12  ;;  %v1108_v27 = vld [vmem:[#allocation2 + $0xb0] sm:$0xff]   ;;  %v56_v33 = vpack.c.bf16 %v49_v32, %v42_v31  ;;  %v1112_v34 = vld [vmem:[#allocation2 + $0xb8] sm:$0xff]   ;;  %v41_v35 = vld [vmem:[%s1332_s0] sm:$0xff] }
  0x1e   :  { %983 = vmatpush3.bf16.msra.mxu1 %v1092_v11  ;;  %v48_v36 = vld [vmem:[%s1332_s0 + $0x38] sm:$0xff]  ;;  %v1113_v38 = vld [vmem:[#allocation2 + $0x140] sm:$0xff]   ;;  %v51_v40 = vld [vmem:[%s1332_s0 + $0x50] sm:$0xff] }
  0x1f   :  { %984 = vmatprep.subr.bf16.mxu1 %v1095_v14  ;;  %497 = vmatprep.mubr.bf16.mxu0 %v56_v33  ;;  %v55_v37 = vpack.c.bf16 %v48_v36, %v41_v35  ;;  %v44_v39 = vld [vmem:[%s1332_s0 + $0x18] sm:$0xff]  ;;  %v1114_v42 = vld [vmem:[#allocation2 + $0x100] sm:$0xff]   ;;  %v43_v44 = vld [vmem:[%s1332_s0 + $0x10] sm:$0xff] }
  0x20   :  { %963 = vmatpush3.bf16.msra.mxu0 %v1094_v13  ;;  %v58_v41 = vpack.c.bf16 %v51_v40, %v44_v39  ;;  %v50_v45 = vld [vmem:[%s1332_s0 + $0x48] sm:$0xff]  ;;  %v1117_v49 = vld [vmem:[#allocation2 + $0x150] sm:$0xff]   ;;  %v1119_v51 = vld [vmem:[#allocation2 + $0x158] sm:$0xff]  }
  0x21   :  { %964 = vmatprep.subr.bf16.mxu0 %v1097_v16  ;;  %v57_v46 = vpack.c.bf16 %v50_v45, %v43_v44  ;;  %v1115_v47 = vld [vmem:[#allocation2 + $0x148] sm:$0xff]   ;;  %v1118_v50 = vld [vmem:[#allocation2 + $0x110] sm:$0xff]   ;;  %v1120_v52 = vld [vmem:[#allocation2 + $0x118] sm:$0xff]  }
  0x22   :  { %985 = vmatpush3.bf16.msra.mxu1 %v1096_v15  ;;  %538 = vmatprep.mubr.bf16.mxu1 %v58_v41  ;;  %v1116_v48 = vld [vmem:[#allocation2 + $0x108] sm:$0xff]   ;;  %v1121_v53 = vld [vmem:[#allocation2 + $0x160] sm:$0xff]   ;;  %v1125_v59 = vld [vmem:[#allocation2 + $0x170] sm:$0xff]  }
  0x23   :  { %986 = vmatprep.subr.bf16.mxu1 %v1099_v18  ;;  %v1122_v54 = vld [vmem:[#allocation2 + $0x120] sm:$0xff]   ;;  %v1123_v55 = vld [vmem:[#allocation2 + $0x168] sm:$0xff]   ;;  %v47_v62 = vld [vmem:[%s1332_s0 + $0x30] sm:$0xff] }
  0x24   :  { %965 = vmatpush3.bf16.msra.mxu0 %v1098_v17  ;;  %v1129_v56 = vld [vmem:[#allocation2 + $0x180] sm:$0xff]   ;;  %v46_v57 = vld [vmem:[%s1332_s0 + $0x28] sm:$0xff]  ;;  %v1126_v1 = vld [vmem:[#allocation2 + $0x130] sm:$0xff]  }
  0x25   :  { %966 = vmatprep.subr.bf16.mxu0 %v1101_v20  ;;  %v1124_v58 = vld [vmem:[#allocation2 + $0x128] sm:$0xff]   ;;  %v53_v60 = vld [vmem:[%s1332_s0 + $0x60] sm:$0xff]  ;;  %v1127_v2 = vld [vmem:[#allocation2 + $0x178] sm:$0xff]  }
  0x26   :  { %987 = vmatpush3.bf16.msra.mxu1 %v1100_v19  ;;  %v60_v61 = vpack.c.bf16 %v53_v60, %v46_v57  ;;  %v54_v63 = vld [vmem:[%s1332_s0 + $0x68] sm:$0xff]  ;;  %v1128_v3 = vld [vmem:[#allocation2 + $0x138] sm:$0xff]   ;;  %v45_v4 = vld [vmem:[%s1332_s0 + $0x20] sm:$0xff] }
  0x27   :  { %988 = vmatprep.subr.bf16.mxu1 %v1103_v22  ;;  %v61_v0 = vpack.c.bf16 %v54_v63, %v47_v62  ;;  %v52_v5 = vld [vmem:[%s1332_s0 + $0x58] sm:$0xff]  ;;  %v1130_v7 = vld [vmem:[%s1335_s3] sm:$0xff]   ;;  %v1131_v8 = vld [vmem:[%s1335_s3 + $0x8] sm:$0xff]  }
  0x28   :  { %967 = vmatpush3.bf16.msra.mxu0 %v1102_v21  ;;  %v59_v6 = vpack.c.bf16 %v52_v5, %v45_v4  ;;  %v1132_v9 = vld [vmem:[%s1335_s3 + $0x10] sm:$0xff]   ;;  %v1133_v10 = vld [vmem:[%s1335_s3 + $0x18] sm:$0xff]   ;;  %v1134_v11 = vld [vmem:[%s1335_s3 + $0x20] sm:$0xff]  }
  0x29   :  { %968 = vmatprep.subr.bf16.mxu0 %v1105_v24  ;;  %v1135_v12 = vld [vmem:[%s1335_s3 + $0x28] sm:$0xff]   ;;  %v1136_v13 = vld [vmem:[%s1335_s3 + $0x30] sm:$0xff]   ;;  %v1137_v14 = vld [vmem:[%s1335_s3 + $0x38] sm:$0xff]  }
  0x2a   :  { %989 = vmatpush3.bf16.msra.mxu1 %v1104_v23  ;;  %v1138_v15 = vld [vmem:[%s1337_s5] sm:$0xff]   ;;  %v1139_v16 = vld [vmem:[%s1337_s5 + $0x8] sm:$0xff]  }
  0x2b   :  { %990 = vmatprep.subr.bf16.mxu1 %v1107_v26  ;;  %v881_v18 = vld [vmem:[%s1334_s2] ss:$0 sm:$0xff] }
  0x2c   :  { %969 = vmatpush3.bf16.msra.mxu0 %v1106_v25 }
  0x2d   :  { %970 = vmatprep.subr.bf16.mxu0 %v1109_v28 }
  0x2e   :  { %991 = vmatpush3.bf16.msra.mxu1 %v1108_v27 }
  0x2f   :  { %992 = vmatprep.subr.bf16.mxu1 %v1111_v30 }
  0x30   :  { %971 = vmatpush3.bf16.msra.mxu0 %v1110_v29 }
  0x31   :  { %1000 = vmatprep.subr.bf16.mxu0 %v1113_v38 }
  0x32   :  { %993 = vmatpush3.bf16.msra.mxu1 %v1112_v34 }
  0x33   :  { %1038 = vmatprep.subr.bf16.mxu1 %v1169_v43  ;;  %498 = vmatmul.mubr.bf16.vlgmr.msra.gmra.mrb[0].mxu0 %v55_v37 }
  0x34   :  { %1001 = vmatpush3.bf16.msra.mxu0 %v1114_v42  ;;  %579 = vmatprep.mubr.bf16.mxu0 %v60_v61 }
  0x35   :  { %539 = vmatmul.mubr.bf16.vlgmr.msra.gmra.mrb[0].mxu1 %v57_v46  ;;  %1002 = vmatprep.subr.bf16.mxu0 %v1115_v47 }
  0x36   :  { %1040 = vmatprep.mubr.msk.bf16.mxu1 %vm1170_vm0, %v1169_v43  ;;  %1039 = vmatpush3.bf16.msra.mxu1 %v1129_v56 }
  0x37   :  { %1044 = vmatprep.subr.bf16.mxu1 %v1169_v43 }
  0x38   :  { %1003 = vmatpush3.bf16.msra.mxu0 %v1116_v48 }
  0x39   :  { %1004 = vmatprep.subr.bf16.mxu0 %v1117_v49 }
  0x3c   :  { %1005 = vmatpush3.bf16.msra.mxu0 %v1118_v50 }
  0x3d   :  { %1006 = vmatprep.subr.bf16.mxu0 %v1119_v51  ;;  %1041 = vmatmul.mubr.msk.bf16.vlgmr.msra.gmra.mrb[4].mxu1 %vm461_vm1, %v61_v0 }
  0x3e   :  { %1060 = vmatprep.mubr.msk.bf16.mxu1 %vm1170_vm0, %v1169_v43  ;;  %1045 = vmatpush3.bf16.msra.mxu1 %v1130_v7 }
  0x3f   :  { %1046 = vmatprep.subr.bf16.mxu1 %v1169_v43 }
  0x40   :  { %1007 = vmatpush3.bf16.msra.mxu0 %v1120_v52  ;;  %v1140_v52 = vld [vmem:[%s1337_s5 + $0x10] sm:$0xff]  }
  0x41   :  { %1008 = vmatprep.subr.bf16.mxu0 %v1121_v53  ;;  %v1141_v53 = vld [vmem:[%s1337_s5 + $0x18] sm:$0xff]  }
  0x42   :  { %1047 = vmatpush3.bf16.msra.mxu1 %v1131_v8 }
  0x43   :  { %1048 = vmatprep.subr.bf16.mxu1 %v1169_v43 }
  0x44   :  { %1009 = vmatpush3.bf16.msra.mxu0 %v1122_v54  ;;  %v932_v54 = vld [vmem:[%s1336_s4] ss:$0 sm:$0xff] }
  0x45   :  { %1010 = vmatprep.subr.bf16.mxu0 %v1123_v55 }
  0x46   :  { %1049 = vmatpush3.bf16.msra.mxu1 %v1132_v9 }
  0x47   :  { %1050 = vmatprep.subr.bf16.mxu1 %v1169_v43 }
  0x48   :  { %1011 = vmatpush3.bf16.msra.mxu0 %v1124_v58 }
  0x49   :  { %1012 = vmatprep.subr.bf16.mxu0 %v1125_v59 }
  0x4a   :  { %1051 = vmatpush3.bf16.msra.mxu1 %v1133_v10 }
  0x4b   :  { %1052 = vmatprep.subr.bf16.mxu1 %v1169_v43 }
  0x4c   :  { %1013 = vmatpush3.bf16.msra.mxu0 %v1126_v1 }
  0x4d   :  { %1014 = vmatprep.subr.bf16.mxu0 %v1127_v2 }
  0x4e   :  { %1053 = vmatpush3.bf16.msra.mxu1 %v1134_v11 }
  0x4f   :  { %1054 = vmatprep.subr.bf16.mxu1 %v1169_v43 }
  0x50   :  { %1015 = vmatpush3.bf16.msra.mxu0 %v1128_v3 }
  0x51   :  { %1064 = vmatprep.subr.bf16.mxu0 %v1169_v43 }
  0x52   :  { %1055 = vmatpush3.bf16.msra.mxu1 %v1135_v12 }
  0x53   :  { %580 = vmatmul.mubr.bf16.vlgmr.msra.gmra.mrb[4].mxu0 %v59_v6  ;;  %1056 = vmatprep.subr.bf16.mxu1 %v1169_v43 }
  0x54   :  { %1072 = vmatprep.mubr.msk.bf16.mxu0 %vm1170_vm0, %v1169_v43  ;;  %1065 = vmatpush3.bf16.msra.mxu0 %v1138_v15 }
  0x55   :  { %1066 = vmatprep.subr.bf16.mxu0 %v1169_v43 }
  0x56   :  { %1057 = vmatpush3.bf16.msra.mxu1 %v1136_v13 }
  0x57   :  { %1058 = vmatprep.subr.bf16.mxu1 %v1169_v43 }
  0x58   :  { %1067 = vmatpush3.bf16.msra.mxu0 %v1139_v16 }
  0x59   :  { %1068 = vmatprep.subr.bf16.mxu0 %v1169_v43 }
  0x5a   :  { %1059 = vmatpush3.bf16.msra.mxu1 %v1137_v14 }
  0x5c   :  { %1069 = vmatpush3.bf16.msra.mxu0 %v1140_v52 }
  0x5d   :  { %1070 = vmatprep.subr.bf16.mxu0 %v1169_v43  ;;  %v941_v43 = vld [vmem:[%s1338_s6] ss:$0 sm:$0xff] }
  0x60   :  { %1071 = vmatpush3.bf16.msra.mxu0 %v1141_v53 }
 0x106   :  { %v972_v17 = vpop.f32.mrb[0].mxu0 }
 0x107   :  { %v973_v19 = vpop.f32.mrb[1].mxu0 }
 0x108   :  { %v974_v20 = vadd.f32 %v973_v19, %v972_v17  ;;  %v975_v21 = vpop.f32.mrb[2].mxu0  ;;  %v994_v22 = vpop.f32.mrb[0].mxu1 }
 0x109   :  { %v976_v23 = vpop.f32.mrb[3].mxu0  ;;  %v995_v26 = vpop.f32.mrb[1].mxu1 }
 0x10a   :  { %v500_v24 = vadd.f32 %v974_v20, %v881_v18  ;;  %v977_v25 = vadd.f32 %v976_v23, %v975_v21  ;;  %v996_v27 = vadd.f32 %v995_v26, %v994_v22  ;;  %v997_v28 = vpop.f32.mrb[2].mxu1 }
 0x10b   :  { %v998_v30 = vpop.f32.mrb[3].mxu1 }
 0x10c   :  { %v503_v29 = vadd.f32 %v977_v25, %v881_v18  ;;  %v541_v31 = vadd.f32 %v996_v27, %v500_v24  ;;  %v999_v32 = vadd.f32 %v998_v30, %v997_v28 }
 0x10e   :  { %v544_v33 = vadd.f32 %v999_v32, %v503_v29 }
 0x110   :  { %v622_v34 = vpop.f32.mrb[4].mxu1 }
 0x111   :  { %v1042_v35 = vpop.f32.mrb[5].mxu1 }
 0x112   :  { %v625_v36 = vpop.f32.mrb[6].mxu1 }
 0x113   :  { %v1043_v37 = vpop.f32.mrb[7].mxu1 }
 0x126   :  { %v1016_v38 = vpop.f32.mrb[4].mxu0 }
 0x127   :  { %v1017_v39 = vpop.f32.mrb[5].mxu0 }
 0x128   :  { %v1018_v40 = vadd.f32 %v1017_v39, %v1016_v38  ;;  %v1019_v41 = vpop.f32.mrb[6].mxu0 }
 0x129   :  { %v1020_v42 = vpop.f32.mrb[7].mxu0 }
 0x12a   :  { %v582_v44 = vadd.f32 %v1018_v40, %v541_v31  ;;  %v1021_v45 = vadd.f32 %v1020_v42, %v1019_v41 }
 0x12c   :  { %v623_v46 = vadd.f32 %v622_v34, %v582_v44  ;;  %v585_v47 = vadd.f32 %v1021_v45, %v544_v33 }
 0x12e   :  { %v626_v48 = vadd.f32 %v625_v36, %v585_v47  ;;  %v629_v49 = vmax.f32 %v623_v46, 0.0 }
 0x130   :  { %v630_v50 = vmax.f32 %v626_v48, 0.0 }
 0x132   :  { %v631_v51 = vpack.c.bf16 %v630_v50, %v629_v49 }
 0x134   :  { %1061 = vmatmul.mubr.bf16.vlgmr.msra.gmra.mrb[8].mxu1 %v631_v51 }
 0x207   :  { %v737_v55 = vpop.f32.mrb[8].mxu1 }
 0x208   :  { %v738_v56 = vadd.f32 %v932_v54, %v737_v55  ;;  %v1062_v57 = vpop.f32.mrb[9].mxu1 }
 0x209   :  { %v740_v58 = vpop.f32.mrb[10].mxu1 }
 0x20a   :  { %v741_v59 = vadd.f32 %v932_v54, %v740_v58  ;;  %v1063_v60 = vpop.f32.mrb[11].mxu1  ;;  %v744_v61 = vmax.f32 %v738_v56, 0.0 }
 0x20c   :  { %v745_v62 = vmax.f32 %v741_v59, 0.0 }
 0x20e   :  { %v746_v63 = vpack.c.bf16 %v745_v62, %v744_v61 }
 0x210   :  { %1073 = vmatmul.mubr.msk.bf16.vlgmr.msra.gmra.mrb[8].mxu0 %vm786_vm2, %v746_v63 }
 0x2e3   :  { %v824_v0 = vpop.f32.mrb[8].mxu0 }
 0x2e4   :  { %v1074_v1 = vpop.f32.mrb[9].mxu0  ;;  %v825_v3 = vadd.f32 %v941_v43, %v824_v0 }
 0x2e5   :  { %v827_v2 = vpop.f32.mrb[10].mxu0 }
 0x2e6   :  { %v828_v4 = vadd.f32 %v941_v43, %v827_v2  ;;  %v1075_v5 = vpop.f32.mrb[11].mxu0 }
 0x2e8   :  { %v954_v6 = vpack.c.bf16 %v828_v4, %v825_v3 }
 0x2ea   :  { %955 = vst [vmem:[#allocation4] sm:$0xff] %v954_v6  }
 0x2f1   :  { %v858_v7 = vld [vmem:[#allocation4] sm:$0xf] }
 0x2f2   :  { %859 = vst [vmem:[%s1339_s7] sm:$0xf] %v858_v7 }
 0x2f3   :  { %876 = vsyncpa [#allocation3], 1 }

</bundles_post_ra>
